<compile_context>
chip_gen: v7x
topology: tpu7x:2x2x1
jax: 0.10.0
libtpu: 0.0.40
codegen_flags: <defaults>
</compile_context>

<pallas_src>
import functools
import math

import numpy as np

import jax
import jax.numpy as jnp
from jax import lax
from jax.experimental import pallas as pl
from jax.experimental.pallas import tpu as pltpu


def _fusion_kernel(bnd_ref, rel_ref,            # SMEM: [B, P+1] int32, [B, P] f32
                   x_ref,                        # VMEM: [1, S, H]
                   wqkv_ref, bqkv_ref,           # VMEM: [H, 3H], [1, 3H]
                   wo_ref, bo_ref,               # VMEM: [H, H], [1, H]
                   out_ref,                      # VMEM: [1, S, H]
                   *, seq_len, hidden, num_passages):
    b = pl.program_id(0)
    S, H = seq_len, hidden
    scale = 1.0 / math.sqrt(H)                   # num_heads = 1 -> head_dim == H

    x = x_ref[0]                                                     # [S, H]

    # Fused QKV in-projection (weight pre-transposed in the wrapper).
    qkv = jnp.dot(x, wqkv_ref[...], preferred_element_type=jnp.float32)
    qkv = qkv + bqkv_ref[...]                                        # [S, 3H]
    q = qkv[:, :H]
    k = qkv[:, H:2 * H]
    v = qkv[:, 2 * H:]

    # Scores for the whole sequence in one MXU call (contract on dim 1 of both
    # operands -> no in-kernel transpose of k).
    s = lax.dot_general(q, k, (((1,), (1,)), ((), ())),
                        preferred_element_type=jnp.float32) * scale  # [S, S]

    # ---- relevance-aware additive mask, built in-register ----
    rows = lax.broadcasted_iota(jnp.int32, (S, S), 0)
    cols = lax.broadcasted_iota(jnp.int32, (S, S), 1)
    q_end = bnd_ref[b, 0]                       # query region is [0, q_end)
    last = bnd_ref[b, num_passages]             # end of the last passage

    rel_bias = jnp.zeros((S, S), jnp.float32)
    same_passage = jnp.zeros((S, S), jnp.bool_)
    for j in range(num_passages):               # static unroll, P is small
        s0 = bnd_ref[b, j]
        e0 = bnd_ref[b, j + 1]
        col_in = (cols >= s0) & (cols < e0)
        row_in = (rows >= s0) & (rows < e0)
        rel_bias = rel_bias + rel_ref[b, j] * col_in.astype(jnp.float32)
        same_passage = same_passage | (row_in & col_in)

    col_in_any = (cols >= q_end) & (cols < last)
    is_query_row = rows < q_end
    # Query rows: bias 1 everywhere except passage columns, which get the
    # passage relevance score.  Passage rows: bias 1 inside the same passage,
    # 0 elsewhere.  Rows past the last boundary: bias 0 (uniform).
    mask = jnp.where(is_query_row,
                     jnp.where(col_in_any, rel_bias, 1.0),
                     jnp.where(same_passage, 1.0, 0.0))

    # PyTorch float attn_mask semantics: mask is ADDED to the scaled scores.
    s = s + mask
    s = s - jnp.max(s, axis=-1, keepdims=True)
    e = jnp.exp(s)
    w = e * pl.reciprocal(jnp.sum(e, axis=-1, keepdims=True), approx=True)

    o = jnp.dot(w, v, preferred_element_type=jnp.float32)            # [S, H]
    o = jnp.dot(o, wo_ref[...], preferred_element_type=jnp.float32) + bo_ref[...]
    out_ref[0] = o.astype(out_ref.dtype)        # single full-block store


def relevance_aware_passage_fusion(hidden_states, relevance_scores,
                                   passage_boundaries, params):
    """hidden_states: [B,S,H] f32; relevance_scores: [B,P] f32;
    passage_boundaries: [B,P+1] int32 (boundaries[:,0] == query end)."""
    B, S, H = hidden_states.shape
    P = passage_boundaries.shape[1] - 1

    # Pre-fuse / pre-transpose projection weights in the wrapper.
    wqkv_t = params["in_proj_weight"].T                     # [H, 3H]
    bqkv = params["in_proj_bias"][None, :]                  # [1, 3H]
    wo_t = params["out_proj_weight"].T                      # [H, H]
    bo = params["out_proj_bias"][None, :]                   # [1, H]

    kernel = functools.partial(_fusion_kernel, seq_len=S, hidden=H,
                               num_passages=P)
    out = pl.pallas_call(
        kernel,
        out_shape=jax.ShapeDtypeStruct((B, S, H), hidden_states.dtype),
        grid=(B,),
        in_specs=[
            pl.BlockSpec(memory_space=pltpu.MemorySpace.SMEM),   # boundaries
            pl.BlockSpec(memory_space=pltpu.MemorySpace.SMEM),   # relevance
            pl.BlockSpec((1, S, H), lambda b: (b, 0, 0)),        # x
            pl.BlockSpec((H, 3 * H), lambda b: (0, 0)),          # Wqkv^T (resident)
            pl.BlockSpec((1, 3 * H), lambda b: (0, 0)),          # bqkv
            pl.BlockSpec((H, H), lambda b: (0, 0)),              # Wo^T
            pl.BlockSpec((1, H), lambda b: (0, 0)),              # bo
        ],
        out_specs=pl.BlockSpec((1, S, H), lambda b: (b, 0, 0)),
        compiler_params=pltpu.CompilerParams(
            dimension_semantics=("parallel",)),
    )(passage_boundaries, relevance_scores, hidden_states, wqkv_t, bqkv, wo_t, bo)
    return out


def _reference(hidden_states, relevance_scores, passage_boundaries, params):
    """Pure JAX/numpy replica of the PyTorch forward (num_heads=1)."""
    B, S, H = hidden_states.shape
    bnd = np.asarray(passage_boundaries)
    rel = np.asarray(relevance_scores)
    mask = np.zeros((B, S, S), np.float32)
    for i in range(B):                       # mirrors create_relevance_attention_mask
        q_end = int(bnd[i, 0])
        mask[i, :q_end, :] = 1.0
        for j in range(bnd.shape[1] - 1):
            s0, e0 = int(bnd[i, j]), int(bnd[i, j + 1])
            mask[i, s0:e0, s0:e0] = 1.0
            mask[i, :q_end, s0:e0] = rel[i, j]
    mask = jnp.asarray(mask)

    w_in, b_in = params["in_proj_weight"], params["in_proj_bias"]
    q = hidden_states @ w_in[:H].T + b_in[:H]
    k = hidden_states @ w_in[H:2 * H].T + b_in[H:2 * H]
    v = hidden_states @ w_in[2 * H:].T + b_in[2 * H:]
    scale = 1.0 / math.sqrt(H)
    s = jnp.einsum("bld,bsd->bls", q, k) * scale + mask
    w = jax.nn.softmax(s, axis=-1)
    o = jnp.einsum("bls,bsd->bld", w, v)
    return o @ params["out_proj_weight"].T + params["out_proj_bias"]


def make_params(hidden, key):
    k1, k2, k3, k4 = jax.random.split(key, 4)
    s = 1.0 / math.sqrt(hidden)
    return {
        "in_proj_weight": jax.random.normal(k1, (3 * hidden, hidden), jnp.float32) * s,
        "in_proj_bias": jax.random.normal(k2, (3 * hidden,), jnp.float32) * s,
        "out_proj_weight": jax.random.normal(k3, (hidden, hidden), jnp.float32) * s,
        "out_proj_bias": jax.random.normal(k4, (hidden,), jnp.float32) * s,
    }


if __name__ == "__main__":
    # num_heads = 1: the module's float mask of shape [B, S, S] is only a
    # valid nn.MultiheadAttention attn_mask when num_heads == 1.
    # TODO(synk): multi-head (num_heads > 1) would need a [B*heads, S, S] mask,
    # which the PyTorch module does not produce; not implemented.
    B, S, H = 2, 16, 32

    key = jax.random.PRNGKey(0)
    kx, kr, kp = jax.random.split(key, 3)
    hidden_states = jax.random.normal(kx, (B, S, H), jnp.float32)
    # 3 passages per example; row 1 exercises the q_end == 0 edge case.
    passage_boundaries = jnp.array([[2, 6, 10, 14],
                                    [0, 5, 9, 16]], jnp.int32)
    relevance_scores = jax.random.uniform(kr, (B, 3), jnp.float32)
    params = make_params(H, kp)

    out = relevance_aware_passage_fusion(hidden_states, relevance_scores,
                                         passage_boundaries, params)
    jax.block_until_ready(out)

    ref = _reference(hidden_states, relevance_scores, passage_boundaries, params)
    assert out.shape == ref.shape
    # Tolerance relaxed slightly for the approx (EUP) reciprocal in the softmax.
    assert jnp.allclose(out, ref, atol=1e-2, rtol=1e-2), \
        float(jnp.max(jnp.abs(out - ref)))

    print("KERNEL_OK")
</pallas_src>

<mosaic_0001>
module attributes {stable_mosaic.version = 11 : i64} {
  func.func @_fusion_kernel(%arg0: i32, %arg1: memref<2x4xi32, #tpu.memory_space<smem>>, %arg2: memref<2x3xf32, #tpu.memory_space<smem>>, %arg3: memref<1x16x32xf32, #tpu.memory_space<vmem>>, %arg4: memref<32x96xf32, #tpu.memory_space<vmem>>, %arg5: memref<1x96xf32, #tpu.memory_space<vmem>>, %arg6: memref<32x32xf32, #tpu.memory_space<vmem>>, %arg7: memref<1x32xf32, #tpu.memory_space<vmem>>, %arg8: memref<1x16x32xf32, #tpu.memory_space<vmem>>) attributes {dimension_semantics = [#tpu.dimension_semantics<parallel>], iteration_bounds = array<i64: 2>, scalar_prefetch = 0 : i64, scratch_operands = 0 : i64, tpu.core_type = #tpu.core_type<tc>, window_params = [{transform_indices = @transform_0, window_bounds = array<i64: 2, 4>}, {transform_indices = @transform_1, window_bounds = array<i64: 2, 3>}, {transform_indices = @transform_2, window_bounds = array<i64: 1, 16, 32>}, {pipeline_mode = #tpu.pipeline_mode<synchronous>, transform_indices = @transform_3, window_bounds = array<i64: 32, 96>}, {pipeline_mode = #tpu.pipeline_mode<synchronous>, transform_indices = @transform_4, window_bounds = array<i64: 1, 96>}, {pipeline_mode = #tpu.pipeline_mode<synchronous>, transform_indices = @transform_5, window_bounds = array<i64: 32, 32>}, {pipeline_mode = #tpu.pipeline_mode<synchronous>, transform_indices = @transform_6, window_bounds = array<i64: 1, 32>}, {transform_indices = @transform_7, window_bounds = array<i64: 1, 16, 32>}]} {
    %c0 = arith.constant 0 : index
    %c0_0 = arith.constant 0 : index
    %c0_1 = arith.constant 0 : index
    %0 = vector.load %arg3[%c0, %c0_0, %c0_1] : memref<1x16x32xf32, #tpu.memory_space<vmem>>, vector<1x16x32xf32>
    %1 = vector.shape_cast %0 : vector<1x16x32xf32> to vector<16x32xf32>
    %c0_2 = arith.constant 0 : index
    %c0_3 = arith.constant 0 : index
    %2 = vector.load %arg4[%c0_2, %c0_3] : memref<32x96xf32, #tpu.memory_space<vmem>>, vector<32x96xf32>
    %cst = arith.constant dense<0.000000e+00> : vector<16x96xf32>
    %3 = tpu.matmul %1, %2, %cst {dimension_numbers = #tpu.dot_dimension_numbers<[1], [0], [0], [1], [0, 0, 1, 1], [], []>} : vector<16x32xf32>, vector<32x96xf32>, vector<16x96xf32> -> vector<16x96xf32>
    %c0_4 = arith.constant 0 : index
    %c0_5 = arith.constant 0 : index
    %4 = vector.load %arg5[%c0_4, %c0_5] : memref<1x96xf32, #tpu.memory_space<vmem>>, vector<1x96xf32>
    %5 = vector.broadcast %4 : vector<1x96xf32> to vector<16x96xf32>
    %6 = arith.addf %3, %5 : vector<16x96xf32>
    %7 = vector.extract_strided_slice %6 {offsets = [0, 0], sizes = [16, 32], strides = [1, 1]} : vector<16x96xf32> to vector<16x32xf32>
    %8 = vector.extract_strided_slice %6 {offsets = [0, 32], sizes = [16, 32], strides = [1, 1]} : vector<16x96xf32> to vector<16x32xf32>
    %9 = vector.extract_strided_slice %6 {offsets = [0, 64], sizes = [16, 32], strides = [1, 1]} : vector<16x96xf32> to vector<16x32xf32>
    %cst_6 = arith.constant dense<0.000000e+00> : vector<16x16xf32>
    %10 = tpu.matmul %7, %8, %cst_6 {dimension_numbers = #tpu.dot_dimension_numbers<[1], [1], [0], [0], [0, 0, 1, 0], [], []>} : vector<16x32xf32>, vector<16x32xf32>, vector<16x16xf32> -> vector<16x16xf32>
    %cst_7 = arith.constant 0.176776692 : f32
    %11 = vector.broadcast %cst_7 : f32 to vector<16x16xf32>
    %12 = arith.mulf %10, %11 : vector<16x16xf32>
    %13 = tpu.iota {dimensions = array<i32: 0>} : vector<16x16xi32>
    %14 = tpu.iota {dimensions = array<i32: 1>} : vector<16x16xi32>
    %15 = arith.index_cast %arg0 : i32 to index
    %c0_8 = arith.constant 0 : index
    %16 = memref.load %arg1[%15, %c0_8] : memref<2x4xi32, #tpu.memory_space<smem>>
    %17 = arith.index_cast %arg0 : i32 to index
    %c3 = arith.constant 3 : index
    %18 = memref.load %arg1[%17, %c3] : memref<2x4xi32, #tpu.memory_space<smem>>
    %cst_9 = arith.constant 0.000000e+00 : f32
    %19 = vector.broadcast %cst_9 : f32 to vector<16x16xf32>
    %false = arith.constant false
    %20 = vector.broadcast %false : i1 to vector<16x16xi1>
    %21 = arith.index_cast %arg0 : i32 to index
    %c0_10 = arith.constant 0 : index
    %22 = memref.load %arg1[%21, %c0_10] : memref<2x4xi32, #tpu.memory_space<smem>>
    %23 = arith.index_cast %arg0 : i32 to index
    %c1 = arith.constant 1 : index
    %24 = memref.load %arg1[%23, %c1] : memref<2x4xi32, #tpu.memory_space<smem>>
    %25 = vector.broadcast %22 : i32 to vector<16x16xi32>
    %26 = arith.cmpi sge, %14, %25 : vector<16x16xi32>
    %27 = vector.broadcast %24 : i32 to vector<16x16xi32>
    %28 = arith.cmpi slt, %14, %27 : vector<16x16xi32>
    %29 = arith.andi %26, %28 : vector<16x16xi1>
    %30 = vector.broadcast %22 : i32 to vector<16x16xi32>
    %31 = arith.cmpi sge, %13, %30 : vector<16x16xi32>
    %32 = vector.broadcast %24 : i32 to vector<16x16xi32>
    %33 = arith.cmpi slt, %13, %32 : vector<16x16xi32>
    %34 = arith.andi %31, %33 : vector<16x16xi1>
    %35 = arith.index_cast %arg0 : i32 to index
    %c0_11 = arith.constant 0 : index
    %36 = memref.load %arg2[%35, %c0_11] : memref<2x3xf32, #tpu.memory_space<smem>>
    %37 = arith.extui %29 : vector<16x16xi1> to vector<16x16xi32>
    %38 = arith.sitofp %37 : vector<16x16xi32> to vector<16x16xf32>
    %39 = vector.broadcast %36 : f32 to vector<16x16xf32>
    %40 = arith.mulf %39, %38 : vector<16x16xf32>
    %41 = arith.addf %19, %40 : vector<16x16xf32>
    %42 = arith.andi %34, %29 : vector<16x16xi1>
    %43 = arith.ori %20, %42 : vector<16x16xi1>
    %44 = arith.index_cast %arg0 : i32 to index
    %c1_12 = arith.constant 1 : index
    %45 = memref.load %arg1[%44, %c1_12] : memref<2x4xi32, #tpu.memory_space<smem>>
    %46 = arith.index_cast %arg0 : i32 to index
    %c2 = arith.constant 2 : index
    %47 = memref.load %arg1[%46, %c2] : memref<2x4xi32, #tpu.memory_space<smem>>
    %48 = vector.broadcast %45 : i32 to vector<16x16xi32>
    %49 = arith.cmpi sge, %14, %48 : vector<16x16xi32>
    %50 = vector.broadcast %47 : i32 to vector<16x16xi32>
    %51 = arith.cmpi slt, %14, %50 : vector<16x16xi32>
    %52 = arith.andi %49, %51 : vector<16x16xi1>
    %53 = vector.broadcast %45 : i32 to vector<16x16xi32>
    %54 = arith.cmpi sge, %13, %53 : vector<16x16xi32>
    %55 = vector.broadcast %47 : i32 to vector<16x16xi32>
    %56 = arith.cmpi slt, %13, %55 : vector<16x16xi32>
    %57 = arith.andi %54, %56 : vector<16x16xi1>
    %58 = arith.index_cast %arg0 : i32 to index
    %c1_13 = arith.constant 1 : index
    %59 = memref.load %arg2[%58, %c1_13] : memref<2x3xf32, #tpu.memory_space<smem>>
    %60 = arith.extui %52 : vector<16x16xi1> to vector<16x16xi32>
    %61 = arith.sitofp %60 : vector<16x16xi32> to vector<16x16xf32>
    %62 = vector.broadcast %59 : f32 to vector<16x16xf32>
    %63 = arith.mulf %62, %61 : vector<16x16xf32>
    %64 = arith.addf %41, %63 : vector<16x16xf32>
    %65 = arith.andi %57, %52 : vector<16x16xi1>
    %66 = arith.ori %43, %65 : vector<16x16xi1>
    %67 = arith.index_cast %arg0 : i32 to index
    %c2_14 = arith.constant 2 : index
    %68 = memref.load %arg1[%67, %c2_14] : memref<2x4xi32, #tpu.memory_space<smem>>
    %69 = arith.index_cast %arg0 : i32 to index
    %c3_15 = arith.constant 3 : index
    %70 = memref.load %arg1[%69, %c3_15] : memref<2x4xi32, #tpu.memory_space<smem>>
    %71 = vector.broadcast %68 : i32 to vector<16x16xi32>
    %72 = arith.cmpi sge, %14, %71 : vector<16x16xi32>
    %73 = vector.broadcast %70 : i32 to vector<16x16xi32>
    %74 = arith.cmpi slt, %14, %73 : vector<16x16xi32>
    %75 = arith.andi %72, %74 : vector<16x16xi1>
    %76 = vector.broadcast %68 : i32 to vector<16x16xi32>
    %77 = arith.cmpi sge, %13, %76 : vector<16x16xi32>
    %78 = vector.broadcast %70 : i32 to vector<16x16xi32>
    %79 = arith.cmpi slt, %13, %78 : vector<16x16xi32>
    %80 = arith.andi %77, %79 : vector<16x16xi1>
    %81 = arith.index_cast %arg0 : i32 to index
    %c2_16 = arith.constant 2 : index
    %82 = memref.load %arg2[%81, %c2_16] : memref<2x3xf32, #tpu.memory_space<smem>>
    %83 = arith.extui %75 : vector<16x16xi1> to vector<16x16xi32>
    %84 = arith.sitofp %83 : vector<16x16xi32> to vector<16x16xf32>
    %85 = vector.broadcast %82 : f32 to vector<16x16xf32>
    %86 = arith.mulf %85, %84 : vector<16x16xf32>
    %87 = arith.addf %64, %86 : vector<16x16xf32>
    %88 = arith.andi %80, %75 : vector<16x16xi1>
    %89 = arith.ori %66, %88 : vector<16x16xi1>
    %90 = vector.broadcast %16 : i32 to vector<16x16xi32>
    %91 = arith.cmpi sge, %14, %90 : vector<16x16xi32>
    %92 = vector.broadcast %18 : i32 to vector<16x16xi32>
    %93 = arith.cmpi slt, %14, %92 : vector<16x16xi32>
    %94 = arith.andi %91, %93 : vector<16x16xi1>
    %95 = vector.broadcast %16 : i32 to vector<16x16xi32>
    %96 = arith.cmpi slt, %13, %95 : vector<16x16xi32>
    %cst_17 = arith.constant 1.000000e+00 : f32
    %97 = vector.broadcast %cst_17 : f32 to vector<16x16xf32>
    %98 = arith.select %94, %87, %97 : vector<16x16xi1>, vector<16x16xf32>
    %cst_18 = arith.constant 1.000000e+00 : f32
    %cst_19 = arith.constant 0.000000e+00 : f32
    %99 = vector.broadcast %cst_18 : f32 to vector<16x16xf32>
    %100 = vector.broadcast %cst_19 : f32 to vector<16x16xf32>
    %101 = arith.select %89, %99, %100 : vector<16x16xi1>, vector<16x16xf32>
    %102 = arith.select %96, %98, %101 : vector<16x16xi1>, vector<16x16xf32>
    %103 = arith.addf %12, %102 : vector<16x16xf32>
    %cst_20 = arith.constant dense<0xFF800000> : vector<16xf32>
    %104 = vector.multi_reduction <maximumf>, %103, %cst_20 [1] : vector<16x16xf32> to vector<16xf32>
    %105 = vector.shape_cast %104 : vector<16xf32> to vector<16x1xf32>
    %106 = vector.broadcast %105 : vector<16x1xf32> to vector<16x16xf32>
    %107 = arith.subf %103, %106 : vector<16x16xf32>
    %108 = math.exp %107 : vector<16x16xf32>
    %cst_21 = arith.constant dense<0.000000e+00> : vector<16xf32>
    %109 = vector.multi_reduction <add>, %108, %cst_21 [1] : vector<16x16xf32> to vector<16xf32>
    %110 = vector.shape_cast %109 : vector<16xf32> to vector<16x1xf32>
    %111 = tpu.reciprocal %110 {approx = true} : vector<16x1xf32> -> vector<16x1xf32>
    %112 = vector.broadcast %111 : vector<16x1xf32> to vector<16x16xf32>
    %113 = arith.mulf %108, %112 : vector<16x16xf32>
    %cst_22 = arith.constant dense<0.000000e+00> : vector<16x32xf32>
    %114 = tpu.matmul %113, %9, %cst_22 {dimension_numbers = #tpu.dot_dimension_numbers<[1], [0], [0], [1], [0, 0, 1, 1], [], []>} : vector<16x16xf32>, vector<16x32xf32>, vector<16x32xf32> -> vector<16x32xf32>
    %c0_23 = arith.constant 0 : index
    %c0_24 = arith.constant 0 : index
    %115 = vector.load %arg6[%c0_23, %c0_24] : memref<32x32xf32, #tpu.memory_space<vmem>>, vector<32x32xf32>
    %cst_25 = arith.constant dense<0.000000e+00> : vector<16x32xf32>
    %116 = tpu.matmul %114, %115, %cst_25 {dimension_numbers = #tpu.dot_dimension_numbers<[1], [0], [0], [1], [0, 0, 1, 1], [], []>} : vector<16x32xf32>, vector<32x32xf32>, vector<16x32xf32> -> vector<16x32xf32>
    %c0_26 = arith.constant 0 : index
    %c0_27 = arith.constant 0 : index
    %117 = vector.load %arg7[%c0_26, %c0_27] : memref<1x32xf32, #tpu.memory_space<vmem>>, vector<1x32xf32>
    %118 = vector.broadcast %117 : vector<1x32xf32> to vector<16x32xf32>
    %119 = arith.addf %116, %118 : vector<16x32xf32>
    %c0_28 = arith.constant 0 : index
    %c0_29 = arith.constant 0 : index
    %c0_30 = arith.constant 0 : index
    %120 = vector.load %arg8[%c0_28, %c0_29, %c0_30] : memref<1x16x32xf32, #tpu.memory_space<vmem>>, vector<1x16x32xf32>
    %121 = vector.shape_cast %120 : vector<1x16x32xf32> to vector<16x32xf32>
    %122 = vector.shape_cast %119 : vector<16x32xf32> to vector<1x16x32xf32>
    tpu.vector_store %arg8[%c0_28, %c0_29, %c0_30], %122 {strides = array<i32>} : memref<1x16x32xf32, #tpu.memory_space<vmem>>, vector<1x16x32xf32>,
    return
  }
  func.func @transform_0(%arg0: i32) -> (i32, i32) {
    %c0_i32 = arith.constant 0 : i32
    %c0_i32_0 = arith.constant 0 : i32
    %c0_i32_1 = arith.constant 0 : i32
    return %c0_i32, %c0_i32_0 : i32, i32
  }
  func.func @transform_1(%arg0: i32) -> (i32, i32) {
    %c0_i32 = arith.constant 0 : i32
    %c0_i32_0 = arith.constant 0 : i32
    %c0_i32_1 = arith.constant 0 : i32
    return %c0_i32, %c0_i32_0 : i32, i32
  }
  func.func @transform_2(%arg0: i32) -> (i32, i32, i32) {
    %c0_i32 = arith.constant 0 : i32
    %c0_i32_0 = arith.constant 0 : i32
    %c0_i32_1 = arith.constant 0 : i32
    return %arg0, %c0_i32, %c0_i32_0 : i32, i32, i32
  }
  func.func @transform_3(%arg0: i32) -> (i32, i32) {
    %c0_i32 = arith.constant 0 : i32
    %c0_i32_0 = arith.constant 0 : i32
    %c0_i32_1 = arith.constant 0 : i32
    return %c0_i32, %c0_i32_0 : i32, i32
  }
  func.func @transform_4(%arg0: i32) -> (i32, i32) {
    %c0_i32 = arith.constant 0 : i32
    %c0_i32_0 = arith.constant 0 : i32
    %c0_i32_1 = arith.constant 0 : i32
    return %c0_i32, %c0_i32_0 : i32, i32
  }
  func.func @transform_5(%arg0: i32) -> (i32, i32) {
    %c0_i32 = arith.constant 0 : i32
    %c0_i32_0 = arith.constant 0 : i32
    %c0_i32_1 = arith.constant 0 : i32
    return %c0_i32, %c0_i32_0 : i32, i32
  }
  func.func @transform_6(%arg0: i32) -> (i32, i32) {
    %c0_i32 = arith.constant 0 : i32
    %c0_i32_0 = arith.constant 0 : i32
    %c0_i32_1 = arith.constant 0 : i32
    return %c0_i32, %c0_i32_0 : i32, i32
  }
  func.func @transform_7(%arg0: i32) -> (i32, i32, i32) {
    %c0_i32 = arith.constant 0 : i32
    %c0_i32_0 = arith.constant 0 : i32
    %c0_i32_1 = arith.constant 0 : i32
    return %arg0, %c0_i32, %c0_i32_0 : i32, i32, i32
  }
}

</mosaic_0001>

<bundles_post_ra>
// kernel: tpu_custom_call.1
= control target key start
LH: loop header
LB: loop body
LE: loop exit
PB: predicated region body
PF: predicated region fallthrough
CT: control target
= control target key end

     0   :  { %s1831_s0 = inlined_call_operand.hbm [shape: s32[2,4], index: 0, kind: input, shape index: {}]   ;;  %s1832_s1 = inlined_call_operand.vmem [shape: f32[2,3], index: 1, kind: input, shape index: {}]   ;;  %s1833_s2 = inlined_call_operand.hbm [shape: f32[2,16,32], index: 2, kind: input, shape index: {}]   ;;  %s1834_s3 = inlined_call_operand.hbm [shape: f32[32,96], index: 3, kind: input, shape index: {}]   ;;  %s1835_s4 = inlined_call_operand.vmem [shape: f32[1,96], index: 4, kind: input, shape index: {}]   ;;  %s1836_s5 = inlined_call_operand.hbm [shape: f32[32,32], index: 5, kind: input, shape index: {}]   ;;  %s1837_s6 = inlined_call_operand.vmem [shape: f32[1,32], index: 6, kind: input, shape index: {}]   ;;  %s1838_s7 = inlined_call_operand.hbm [shape: f32[2,16,32], index: 7, kind: output, shape index: {}]  }
   0x1   :  { %1845 = sst [smem:[#allocation18_spill]] %s1832_s1 }
   0x2   :  { %12 = vsyncpa [#allocation5], 0 }
   0x3   :  { %13 = vsyncpa [#allocation6], 0 }
   0x4   :  { %14 = vsyncpa [#allocation3], 0 }
   0x5   :  { %16 = vsyncpa [#allocation3 + $0x1], 0 }
   0x6   :  { %17 = vsyncpa [#allocation10], 0 }
   0x7   :  { %18 = vsyncpa [#allocation4], 0 }
   0x8   :  { %20 = vsyncpa [#allocation4 + $0x1], 0  ;;  %s1434_s24 = smov 0   ;;  %s1436_s25 = smov 0  }
   0x9   :  { %s1438_s26 = smov 0   ;;  %s1440_s27 = smov 0  }
   0xa LB: > { %s1455_s28 = sadd.s32 4294967295, %s1379_s27   ;;  %s953_s29 = sadd.s32 4294967294, %s1379_s27   ;;  %s1379_s27 = sphi %s1440_s27, %s1890_s27   ;;  %s1375_s26 = sphi %s1438_s26, %s1889_s26   ;;  %s1371_s25 = sphi %s1436_s25, %s1888_s25   ;;  %s1367_s24 = sphi %s1434_s24, %s1887_s24  }
   0xb   : > { %p88_p0 = scmp.ne.s32.totalorder %s1371_s25, %s1367_s24  ;;  %p1839_p1 = scmp.eq.s32.totalorder %s1455_s28, 0 }
   0xc   : > { %p202_p3 = scmp.eq.s32.totalorder %s953_s29, 1  ;;  %p954_p5 = scmp.ge.s32.totalorder %s1379_s27, 1 }
   0xd   : > { %p1464_p4 = por %p1839_p1, %p88_p0  ;;  %p209_p7 = scmp.lt.s32.totalorder %s1379_s27, 3 }
   0xe   : > { %p1469_p6 = por %p202_p3, %p88_p0  ;;  %s1381_s10 = smov [#allocation9]  }
   0xf   : > { %s1846_s30 = scalar_select %p1464_p4, 1, 0 }
  0x10   : > { %s1847_s8 = scalar_select %p1469_p6, 1, 0 }
  0x11   : > { %p1474_p8 = pnand %p954_p5, %p209_p7  ;;  %s241_s11 = sshll.u32 %s1381_s10, 4  ;;  %s242_s11 = int_to_ptr.vmem [resolvable:$true] %s241_s11 }
  0x12   : > { %s1850_s1 = sld [smem:[#allocation18_spill]]  ;;  %s1187_s18 = scalar_lea.hbm %s1834_s3, 512 }
  0x13   : > { %s1848_s9 = scalar_select %p1474_p8, 1, 0 }
  0x14   : > { %p1095_p9 = pneg %p1474_p8  ;;  %p1188_p12 = scmp.ne.s32.totalorder %s1834_s3, %s1187_s18 }
  0x15   : > { %p1194_p5 = scmp.lt.u32.totalorder %s1187_s18, %s1834_s3 }
  0x16   : > { %p1483_p11 = pnand %p1095_p9, %p1839_p1 }
  0x18   : > { %s231_s15 = sshll.u32 %s1850_s1, 4  ;;  %p1500_p13 = pneg %p1483_p11  ;;  %s1490_s15 = int_to_ptr.vmem [resolvable:$true] %s231_s15 }
  0x1a   : > { %p1190_p0 = pnand %p1500_p13, %p1188_p12 }
  0x1c   : > { %p1191_p3 = pneg %p1190_p0 }
  0x1e   : > { %p1196_p7 = pnand %p1194_p5, %p1191_p3 }
  0x20   : > { %1199 = shalt.err (!%p1196_p7)
}
  0x21   : > { %s1200_s29 = scalar_lea.vmem %s242_s11, 512  ;;  %p1208_p2 = scmp.lt.s32.totalorder %s242_s11, %s242_s11 }
  0x22   : > { %p1201_p9 = scmp.ne.s32.totalorder %s242_s11, %s1200_s29  ;;  %p1209_p6 = scmp.lt.s32.totalorder %s1200_s29, %s1200_s29 }
  0x24   : > { %p1203_p10 = pnand %p1201_p9, %p1500_p13  ;;  %p1210_p4 = por %p1209_p6, %p1208_p2 }
  0x26   : > { %p1204_p1 = pneg %p1203_p10 }
  0x28   : > { %p1211_p8 = pnand %p1210_p4, %p1204_p1 }
  0x2a   : > { %1214 = shalt.err (!%p1211_p8)
}
  0x2b   : > { %s1382_s10 = smov 128   ;;  %s1383_s13 = smov 8  }
  0x2c   : > { %1104 = dma.hbm_to_vmem [thread:$0]  (!%p1483_p11), %s1834_s3, 512, %s242_s11, [#allocation10], %s1382_s10, %s1382_s10, %s1383_s13  }
  0x2d   : > { %s1215_s19 = scalar_lea.hbm %s1831_s0, 32 }
  0x2e   : > { %p1216_p1 = scmp.ne.s32.totalorder %s1831_s0, %s1215_s19  ;;  %p1222_p6 = scmp.lt.u32.totalorder %s1215_s19, %s1831_s0 }
  0x30   : > { %p1218_p2 = pnand %p1216_p1, %p1500_p13 }
  0x32   : > { %p1219_p4 = pneg %p1218_p2 }
  0x34   : > { %p1224_p8 = pnand %p1222_p6, %p1219_p4 }
  0x36   : > { %1227 = shalt.err (!%p1224_p8)
}
  0x37   : > { %s1384_s1 = smov [#allocation2]   ;;  %s1228_s16 = scalar_lea.vmem %s1490_s15, 32 }
  0x38   : > { %1098 = dma.hbm_to_smem (!%p1483_p11), %s1831_s0, 32, %s1384_s1, [#allocation5]  }
  0x39   : > { %p1229_p10 = scmp.ne.s32.totalorder %s1490_s15, %s1228_s16  ;;  %p1236_p3 = scmp.lt.s32.totalorder %s1490_s15, %s1490_s15 }
  0x3a   : > { %p1237_p5 = scmp.lt.s32.totalorder %s1228_s16, %s1228_s16 }
  0x3b   : > { %p1231_p12 = pnand %p1229_p10, %p1500_p13 }
  0x3c   : > { %p1238_p7 = por %p1237_p5, %p1236_p3 }
  0x3d   : > { %p1232_p0 = pneg %p1231_p12 }
  0x3f   : > { %p1239_p9 = pnand %p1238_p7, %p1232_p0 }
  0x41   : > { %1242 = shalt.err (!%p1239_p9)
}
  0x42   : > { %s1385_s17 = smov [#allocation7]   ;;  %s1386_s18 = smov [#allocation11]  }
  0x43   : > { %1101 = dma.vmem_to_smem (!%p1483_p11), %s1490_s15, 32, %s1385_s17, [#allocation6]  }
  0x44   : > { %s257_s19 = sshll.u32 %s1386_s18, 4  ;;  %s1243_s22 = scalar_lea.hbm %s1836_s5, 512  ;;  %s258_s19 = int_to_ptr.vmem [resolvable:$true] %s257_s19 }
  0x45   : > { %p1244_p1 = scmp.ne.s32.totalorder %s1836_s5, %s1243_s22  ;;  %p1250_p6 = scmp.lt.u32.totalorder %s1243_s22, %s1836_s5 }
  0x47   : > { %p1246_p2 = pnand %p1244_p1, %p1500_p13 }
  0x49   : > { %p1247_p4 = pneg %p1246_p2 }
  0x4b   : > { %p1252_p8 = pnand %p1250_p6, %p1247_p4 }
  0x4d   : > { %1255 = shalt.err (!%p1252_p8)
}
  0x4e   : > { %s1256_s15 = scalar_lea.vmem %s258_s19, 512  ;;  %p1264_p3 = scmp.lt.s32.totalorder %s258_s19, %s258_s19 }
  0x4f   : > { %p1257_p10 = scmp.ne.s32.totalorder %s258_s19, %s1256_s15  ;;  %p1265_p5 = scmp.lt.s32.totalorder %s1256_s15, %s1256_s15 }
  0x51   : > { %p1259_p12 = pnand %p1257_p10, %p1500_p13  ;;  %p1266_p7 = por %p1265_p5, %p1264_p3 }
  0x53   : > { %p1260_p0 = pneg %p1259_p12 }
  0x55   : > { %p1267_p9 = pnand %p1266_p7, %p1260_p0 }
  0x57   : > { %1270 = shalt.err (!%p1267_p9)
}
  0x58   : > { %1107 = dma.hbm_to_vmem [thread:$0]  (!%p1483_p11), %s1836_s5, 512, %s258_s19, [#allocation10], %s1382_s10, %s1382_s10, %s1383_s13  }
  0x59   : > { %s1566_s21 = sadd.s32 1, %s1379_s27   ;;  %s75_s12 = sadd.s32 1, %s1375_s26 }
  0x5a   : > { %s72_s18 = ssub.s32 %s1379_s27, %s1566_s21  ;;  %p82_p13 = scmp.ne.s32.totalorder %s1375_s26, %s1371_s25 }
  0x5b   : > { %p73_p1 = scmp.eq.s32.totalorder %s72_s18, 0  ;;  %p83_p2 = scmp.eq.s32.totalorder %s1379_s27, 0 }
  0x5c   : > { %p1852_p4 = scmp.eq.s32.totalorder %s1455_s28, 1  ;;  %p1120_p8 = scmp.lt.s32.totalorder %s1379_s27, 2 }
  0x5d   : > { %s1582_s20 = scalar_select %p73_p1, %s1375_s26, %s75_s12  }
  0x5e   : > { %p1576_p6 = por %p1852_p4, %p82_p13  ;;  %p84_p10 = por %p83_p2, %p82_p13 }
  0x5f   : > { %s274_s22 = sand.u32 1, %s1375_s26   ;;  %s991_s19 = sshll.u32 %s1379_s27, 8 }
  0x60   : > { %s960_s23 = sshll.u32 %s274_s22, 4  ;;  %s1589_s14 = scalar_lea.hbm %s1833_s2, %s991_s19 }
  0x61   : > { %s278_s15 = scalar_lea.vmem [#allocation8], %s960_s23  ;;  %p1593_p11 = pnand %p1120_p8, %p84_p10 }
  0x62   : > { %s285_s16 = sshll.u32 %s278_s15, 4  ;;  %s1597_s12 = scalar_lea.sflag [#allocation3], %s274_s22  ;;  %s1591_s16 = int_to_ptr.vmem [resolvable:$true] %s285_s16 }
  0x63   : > { %s1271_s18 = scalar_lea.hbm %s1589_s14, 256  ;;  %p1273_p0 = pneg %p1593_p11 }
  0x64   : > { %p1272_p12 = scmp.ne.s32.totalorder %s1589_s14, %s1271_s18  ;;  %s1276_s29 = scalar_lea.hbm %s1833_s2, 512 }
  0x65   : > { %p1277_p7 = scmp.lt.u32.totalorder %s1589_s14, %s1833_s2  ;;  %p1278_p9 = scmp.lt.u32.totalorder %s1276_s29, %s1271_s18 }
  0x66   : > { %p1274_p3 = pnand %p1273_p0, %p1272_p12  ;;  %p1280_p1 = scmp.lt.u32.totalorder %s1271_s18, %s1589_s14 }
  0x67   : > { %p1279_p13 = por %p1278_p9, %p1277_p7 }
  0x68   : > { %p1275_p5 = pneg %p1274_p3 }
  0x69   : > { %p1281_p2 = por %p1280_p1, %p1279_p13 }
  0x6b   : > { %p1282_p4 = pnand %p1281_p2, %p1275_p5 }
  0x6d   : > { %1285 = shalt.err (!%p1282_p4)
}
  0x6e   : > { %s1286_s22 = scalar_lea.vmem %s1591_s16, 256  ;;  %s1387_s23 = smov [#allocation8]  }
  0x6f   : > { %p1287_p8 = scmp.ne.s32.totalorder %s1591_s16, %s1286_s22  ;;  %s1291_s19 = sshll.u32 %s1387_s23, 4  ;;  %s1292_s19 = int_to_ptr.vmem [resolvable:$false] %s1291_s19 }
  0x70   : > { %s1293_s11 = scalar_lea.vmem %s1292_s19, 512  ;;  %p1294_p3 = scmp.lt.s32.totalorder %s1591_s16, %s1292_s19 }
  0x71   : > { %p1289_p10 = pnand %p1287_p8, %p1273_p0  ;;  %p1295_p7 = scmp.lt.s32.totalorder %s1293_s11, %s1286_s22 }
  0x73   : > { %p1290_p12 = pneg %p1289_p10  ;;  %p1296_p9 = por %p1295_p7, %p1294_p3 }
  0x75   : > { %p1297_p13 = pnand %p1296_p9, %p1290_p12 }
  0x77   : > { %1300 = shalt.err (!%p1297_p13)
}
  0x78   : > { %1111 = dma.hbm_to_vmem [thread:$0]  (!%p1593_p11), %s1589_s14, 256, %s1591_s16, %s1597_s12, %s1382_s10, %s1382_s10, %s1383_s13  }
  0x79   : > { %p1855_p0 = scmp.ne.s32.totalorder %s1848_s9, 0 }
  0x7a   : > { %p1856_p5 = scmp.eq.s32.totalorder (!%p1855_p0), %s1455_s28, 0 }
  0x7b   : > { %297 = sbr.rel (%p1855_p0) target bundleno = 1478 (0x5c6), region = 48 }
  0x82   : > { %1346 = dma.done.wait (%p1856_p5), [#allocation5], 32   ;;  %p1857_p1 = pmov %p1856_p5 }
  0x84   : > { %1348 = vsyncadd (%p1857_p1), [#allocation5], 4294967264  ;;  %p1858_p2 = pmov %p1857_p1 }
  0x85   : > { %p1859_p4 = pmov %p1857_p1 }
  0x86   : > { %1350 = dma.done.wait (%p1858_p2), [#allocation6], 32  }
  0x87   : > { %1352 = vsyncadd (%p1859_p4), [#allocation6], 4294967264  ;;  %s1639_s17 = sand.u32 1, %s1371_s25   ;;  %p1860_p11 = scmp.ne.s32.totalorder %s1846_s30, 0 }
  0x88   : > { %s966_s9 = sshll.u32 %s1639_s17, 4  ;;  %s308_s10 = scalar_lea.sflag [#allocation3], %s1639_s17 }
  0x89   : > { %s311_s13 = scalar_lea.vmem [#allocation8], %s966_s9 }
  0x8a   : > { %1354 = dma.done.wait (%p1860_p11), %s308_s10, 256  }
  0x8b   : > { %1356 = vsyncadd (%p1860_p11), %s308_s10, 4294967040  ;;  %p1861_p8 = pmov %p1857_p1 }
  0x8c   : > { %p1862_p10 = pmov %p1857_p1 }
  0x8d   : > { %1358 = dma.done.wait (%p1861_p8), [#allocation10], 1024  }
  0x8e   : > { %1360 = vsyncadd (%p1862_p10), [#allocation10], 4294966272 }
  0x8f   : > { %324 = sfence }
  0x90   : > { %v353_v0 = vld [vmem:[#allocation9] sm:$0xff]  ;;  %v354_v1 = vld [vmem:[#allocation9 + $0x8] sm:$0xff]  ;;  %v355_v2 = vld [vmem:[#allocation9 + $0x10] sm:$0xff]  ;;  %vm1842_vm0 = vcmask 261120   ;;  %s1388_s16 = smov 96   ;;  %s1666_s12 = sshll.u32 %s1455_s28, 7  ;;  %v537_v18 = vlaneseq }
  0x91   : > { %v1049_v3 = vpack.c.bf16 %v354_v1, %v353_v0  ;;  %v356_v4 = vld [vmem:[#allocation9 + $0x18] sm:$0xff]  ;;  %v351_v5 = vld [vmem:[%s311_s13] sm:$0xff]  ;;  %vm1058_vm1 = vmpackc.low %vm1842_vm0, %vm1842_vm0  ;;  %s546_s18 = sadd.s32 1, %s1666_s12  ;;  %s567_s29 = sadd.s32 2, %s1666_s12  ;;  %v1389_v30 = vmov 0.0  }
  0x92   : > { %v1053_v6 = vpack.c.bf16 %v356_v4, %v355_v2  ;;  %1021 = vmatprep.mubr.msk.f32.mxu0 %vm1842_vm0, %v351_v5  ;;  %v352_v7 = vld [vmem:[%s311_s13 + $0x8] sm:$0xff]  ;;  %v970_v8 = vld [vmem:[%s1835_s4] ss:$0 sm:$0xff]  ;;  %s543_s15 = sld [smem:[#allocation2 + %s1666_s12]]  ;;  %v1671_v19 = vshrl.u32 %v537_v18, 7  ;;  %s544_s19 = sadd.s32 3, %s1666_s12 }
  0x93   : > { %1050 = vmatprep.subr.bf16.mxu0 %v1049_v3  ;;  %s547_s22 = sld [smem:[#allocation2 + %s546_s18]]  ;;  %v541_v20 = vand.u32 127, %v537_v18  ;;  %s1390_s14 = smov 64   ;;  %v729_v5 = vld [vmem:[#allocation11] sm:$0xff] }
  0x94   : > { %1052 = vmatpush3.bf16.msra.mxu0 %v1049_v3  ;;  %s568_s23 = sld [smem:[#allocation2 + %s567_s29]]  ;;  %v1675_v21 = vadd.s32 8, %v1671_v19 }
  0x95   : > { %1054 = vmatprep.subr.bf16.mxu0 %v1053_v6  ;;  %s545_s11 = sld [smem:[#allocation2 + %s544_s19]] }
  0x96   : > { %s559_s10 = sld [smem:[#allocation7 + %s1666_s12]] }
  0x97   : > { %s579_s13 = sld [smem:[#allocation7 + %s546_s18]] }
  0x98   : > { %1056 = vmatpush3.bf16.msra.mxu0 %v1053_v6  ;;  %v1677_v22 = vstv %s543_s15  ;;  %s599_s30 = sld [smem:[#allocation7 + %s567_s29]]  ;;  %v730_v6 = vld [vmem:[#allocation11 + $0x8] sm:$0xff]  ;;  %s992_s15 = sshll.u32 %s1455_s28, 8 }
  0x99   : > { %v550_v23 = vstv %s547_s22  ;;  %vm1843_vm2 = vcmp.ge.s32.totalorder %v541_v20, %v1677_v22  ;;  %vm554_vm4 = vcmp.ge.s32.totalorder %v1675_v21, %v1677_v22  ;;  %s1785_s19 = scalar_lea.hbm %s1838_s7, %s992_s15 }
  0x9a   : > { %vm551_vm3 = vcmp.lt.s32.totalorder %v541_v20, %v550_v23  ;;  %v570_v24 = vstv %s568_s23  ;;  %vm556_vm5 = vcmp.lt.s32.totalorder %v1675_v21, %v550_v23  ;;  %vm574_vm6 = vcmp.ge.s32.totalorder %v1675_v21, %v550_v23 }
  0x9b   : > { %1022 = vmatmul.mubr.msk.f32.vlgmr.msra.gmra.mrb[0].mxu0 %vm1842_vm0, %v352_v7  ;;  %vm576_vm7 = vcmp.lt.s32.totalorder %v1675_v21, %v570_v24  ;;  %vm1688_vm8 = vmand %vm1843_vm2, %vm551_vm3  ;;  %vm569_vm9 = vcmp.ge.s32.totalorder %v541_v20, %v550_v23  ;;  %vm571_vm10 = vcmp.lt.s32.totalorder %v541_v20, %v570_v24  ;;  %v590_v27 = vstv %s545_s11  ;;  %v731_v7 = vld [vmem:[#allocation11 + $0x10] sm:$0xff]  ;;  %s1391_s11 = smov [#allocation12]  }
  0x9c   : > { %vm1692_vm11 = vmand %vm554_vm4, %vm556_vm5  ;;  %vm589_vm15 = vcmp.ge.s32.totalorder %v541_v20, %v570_v24  ;;  %v978_v31 = vsel %vm1688_vm8, 1.0, %v1389_v30  ;;  %v562_v32 = vstv %s559_s10  ;;  %vm553_vm4 = vcmp.ge.s32.totalorder %v1671_v19, %v1677_v22  ;;  %s1305_s10 = sshll.u32 %s1391_s11, 4  ;;  %s1306_s10 = int_to_ptr.vmem [resolvable:$false] %s1305_s10 }
  0x9d   : > { %vm1696_vm12 = vmand %vm574_vm6, %vm576_vm7  ;;  %vm555_vm5 = vcmp.lt.s32.totalorder %v1671_v19, %v550_v23  ;;  %v582_v34 = vstv %s579_s13  ;;  %vm573_vm7 = vcmp.ge.s32.totalorder %v1671_v19, %v550_v23  ;;  %v563_v38 = vmul.f32 %v978_v31, %v562_v32  ;;  %v983_v23 = vld [vmem:[%s1837_s6] ss:$0 sm:$0xff]  ;;  %s1307_s13 = scalar_lea.vmem %s1306_s10, 512 }
  0x9e   : > { %vm1700_vm13 = vmand %vm569_vm9, %vm571_vm10  ;;  %vm575_vm9 = vcmp.lt.s32.totalorder %v1671_v19, %v570_v24  ;;  %v602_v42 = vstv %s599_s30 }
  0x9f   : > { %vm566_vm14 = vmand %vm1692_vm11, %vm1688_vm8  ;;  %v979_v33 = vsel %vm1700_vm13, 1.0, %v1389_v30  ;;  %vm594_vm11 = vcmp.ge.s32.totalorder %v1675_v21, %v570_v24 }
  0xa0   : > { %vm586_vm3 = vmand %vm1696_vm12, %vm1700_vm13  ;;  %vm596_vm12 = vcmp.lt.s32.totalorder %v1675_v21, %v590_v27  ;;  %v583_v39 = vmul.f32 %v979_v33, %v582_v34 }
  0xa1   : > { %vm1726_vm10 = vmor %vm566_vm14, %vm586_vm3  ;;  %vm593_vm14 = vcmp.ge.s32.totalorder %v1671_v19, %v570_v24  ;;  %vm595_vm3 = vcmp.lt.s32.totalorder %v1671_v19, %v590_v27 }
  0xa2   : > { %vm1736_vm2 = vmand %vm594_vm11, %vm596_vm12  ;;  %v584_v43 = vadd.f32 %v583_v39, %v563_v38 }
 0x16e   : > { %v1023_v9 = vpop.f32.mrb[0].mxu0 }
 0x16f   : > { %v443_v10 = vadd.f32 %v1023_v9, %v970_v8  ;;  %v437_v11 = vpop.f32.mrb[1].mxu0  ;;  %v732_v9 = vld [vmem:[#allocation11 + $0x18] sm:$0xff] }
 0x170   : > { %v438_v12 = vadd.f32 %v970_v8, %v437_v11  ;;  %v1067_v8 = vpack.c.bf16 %v730_v6, %v729_v5 }
 0x172   : > { %1028 = vmatprep.mubr.msk.f32.mxu1 %vm1842_vm0, %v438_v12  ;;  %v1659_v13 = vpack.i.bf16 %v443_v10, %v438_v12 }
 0x174   : > { %1170 = vrot.lane.b32.xlu0 %v1659_v13, %s1388_s16  ;;  %s350_s16 = scalar_lea.vmem [#allocation12], %s966_s9  ;;  %s824_s9 = scalar_lea.sflag [#allocation4], %s1639_s17 }
 0x175   : > { %s837_s12 = sshll.u32 %s350_s16, 4  ;;  %s1780_s12 = int_to_ptr.vmem [resolvable:$true] %s837_s12 }
 0x176   : > { %s1301_s28 = scalar_lea.vmem %s1780_s12, 256  ;;  %p1308_p9 = scmp.lt.s32.totalorder %s1780_s12, %s1306_s10 }
 0x177   : > { %p1302_p12 = scmp.ne.s32.totalorder %s1780_s12, %s1301_s28  ;;  %p1309_p13 = scmp.lt.s32.totalorder %s1307_s13, %s1301_s28 }
 0x179   : > { %p1303_p3 = pnand %p1302_p12, %p1576_p6  ;;  %p1310_p0 = por %p1309_p13, %p1308_p9 }
 0x17b   : > { %p1304_p7 = pneg %p1303_p3 }
 0x17d   : > { %p1311_p5 = pnand %p1310_p0, %p1304_p7 }
 0x1e6   : > { %v1171_v14 = vpop.permute.xlu0 %1170 }
 0x1e7   : > { %v1173_v15 = vunpack.i.h.bf16 %v1171_v14  ;;  %v1172_v16 = vunpack.i.l.bf16 %v1171_v14 }
 0x1e9   : > { %v1057_v17 = vpack.c.bf16 %v1173_v15, %v1172_v16 }
 0x1eb   : > { %1059 = vmatprep.subr.msk.bf16.mxu1 %vm1058_vm1, %v1057_v17 }
 0x1ec   : > { %1062 = vmatpush3.bf16.xpose.msk.msra.mxu1 %vm1058_vm1, %v1057_v17  ;;  %vm1844_vm1 = vcmp.lt.s32.totalorder %v541_v20, %v590_v27 }
 0x1ed   : > { %vm1720_vm6 = vmand %vm589_vm15, %vm1844_vm1  ;;  %1068 = vmatprep.subr.bf16.mxu1 %v1067_v8 }
 0x1ee   : > { %vm577_vm15 = vmand %vm573_vm7, %vm575_vm9  ;;  %v980_v41 = vsel %vm1720_vm6, 1.0, %v1389_v30 }
 0x1ef   : > { %v603_v44 = vmul.f32 %v980_v41, %v602_v42  ;;  %vm597_vm7 = vmand %vm593_vm14, %vm595_vm3  ;;  %vm611_vm14 = vcmp.lt.s32.totalorder %v1675_v21, %v1677_v22 }
 0x1f0   : > { %vm606_vm9 = vmand %vm1736_vm2, %vm1720_vm6  ;;  %vm610_vm2 = vcmp.lt.s32.totalorder %v1671_v19, %v1677_v22 }
 0x1f1   : > { %vm605_vm12 = vmand %vm597_vm7, %vm1720_vm6  ;;  %v604_v45 = vadd.f32 %v603_v44, %v584_v43  ;;  %vm619_vm6 = vcmask 130048  }
 0x1f2   : > { %vm608_vm1 = vmor %vm1726_vm10, %vm606_vm9 }
 0x1f3   : > { %1029 = vmatmul.mubr.msk.f32.vlgmr.msra.gmra.mrb[0].mxu1 %vm1842_vm0, %v443_v10  ;;  %vm1732_vm0 = vmand %vm553_vm4, %vm555_vm5  ;;  %v614_v47 = vsel %vm608_vm1, 1.0, %v1389_v30  ;;  %v1071_v10 = vpack.c.bf16 %v732_v9, %v731_v7  ;;  %vm1881_vm1 = vcmask 261120  }
 0x1f4   : > { %vm565_vm4 = vmand %vm1732_vm0, %vm1688_vm8  ;;  %vm1879_vm0 = vcmp.lt.s32.totalorder %v541_v20, %v590_v27  ;;  %vm1880_vm8 = vcmp.ge.s32.totalorder %v541_v20, %v1677_v22  ;;  %1070 = vmatpush3.bf16.msra.mxu1 %v1067_v8 }
 0x1f5   : > { %vm585_vm5 = vmand %vm577_vm15, %vm1700_vm13  ;;  %1072 = vmatprep.subr.bf16.mxu1 %v1071_v10 }
 0x1f6   : > { %vm587_vm11 = vmor %vm565_vm4, %vm585_vm5 }
 0x1f7   : > { %vm609_vm13 = vmand %vm1880_vm8, %vm1879_vm0 }
 0x1f8   : > { %vm607_vm15 = vmor %vm587_vm11, %vm605_vm12  ;;  %v612_v46 = vsel %vm609_vm13, %v604_v45, 1.0  ;;  %1074 = vmatpush3.bf16.msra.mxu1 %v1071_v10 }
 0x1f9   : > { %v613_v48 = vsel %vm607_vm15, 1.0, %v1389_v30  ;;  %v616_v50 = vsel %vm611_vm14, %v612_v46, %v614_v47  ;;  %vm1882_vm10 = vmmov %vm1881_vm1 }
 0x1fa   : > { %v615_v53 = vsel %vm610_vm2, %v612_v46, %v613_v48  ;;  %vm1883_vm3 = vmmov %vm1881_vm1 }
 0x1fb   : > { %vm1884_vm4 = vmmov %vm1881_vm1 }
 0x2c6   : > { %v1030_v49 = vpop.f32.mrb[0].mxu1 }
 0x2c7   : > { %v536_v51 = vmul.f32 0.17677669, %v1030_v49  ;;  %v526_v52 = vpop.f32.mrb[1].mxu1 }
 0x2c8   : > { %v535_v54 = vmul.f32 0.17677669, %v526_v52 }
 0x2c9   : > { %v618_v55 = vadd.f32 %v616_v50, %v536_v51 }
 0x2ca   : > { %v617_v56 = vadd.f32 %v615_v53, %v535_v54 }
 0x2cb   : > { %v623_v57 = vsel %vm619_vm6, %v618_v55, -inf }
 0x2cc   : > { %624 = vmax.xlane.f32.xlu1 %v623_v57  ;;  %v620_v58 = vsel %vm619_vm6, %v617_v56, -inf }
 0x2cd   : > { %621 = vmax.xlane.f32.xlu0 %v620_v58 }
 0x359   : > { %v625_v59 = vpop.xlane.xlu1 %624 }
 0x35a   : > { %v627_v60 = vsub.f32 %v618_v55, %v625_v59  ;;  %v622_v61 = vpop.xlane.xlu0 %621 }
 0x35b   : > { %v626_v62 = vsub.f32 %v617_v56, %v622_v61 }
 0x35c   : > { %v630_v63 = vmul.f32 1.442695, %v627_v60 }
 0x35d   : > { %v628_v0 = vmul.f32 1.442695, %v626_v62 }
 0x35e   : > { %1179 = vpow2.f32 %v630_v63 }
 0x35f   : > { %1181 = vpow2.f32 %v628_v0 }
 0x368   : > { %v1180_v1 = vpop.eup %1179 }
 0x369   : > { %v635_v2 = vsel %vm619_vm6, %v1180_v1, 0.0  ;;  %v1182_v3 = vpop.eup %1181 }
 0x36a   : > { %636 = vadd.xlane.f32.xlu1 %v635_v2  ;;  %v632_v4 = vsel %vm619_vm6, %v1182_v3, 0.0 }
 0x36e   : > { %633 = vadd.xlane.f32.xlu1 %v632_v4 }
 0x37f   : > { %1175 = vrot.lane.b32.xlu1 %v1659_v13, %s1390_s14 }
 0x3f7   : > { %v637_v11 = vpop.xlane.xlu1 %636 }
 0x3f8   : > { %1183 = vrcp.f32 %v637_v11 }
 0x3fb   : > { %v634_v12 = vpop.xlane.xlu1 %633 }
 0x3fc   : > { %1185 = vrcp.f32 %v634_v12 }
 0x3ff   : > { %v1176_v14 = vpop.permute.xlu1 %1175 }
 0x400   : > { %v1178_v15 = vunpack.i.h.bf16 %v1176_v14  ;;  %v1177_v16 = vunpack.i.l.bf16 %v1176_v14 }
 0x402   : > { %v1063_v17 = vpack.c.bf16 %v1178_v15, %v1177_v16  ;;  %v1184_v13 = vpop.eup %1183 }
 0x403   : > { %v641_v20 = vmul.f32 %v1184_v13, %v1180_v1 }
 0x404   : > { %1064 = vmatprep.subr.bf16.mxu0 %v1063_v17 }
 0x405   : > { %1066 = vmatpush3.bf16.msra.mxu0 %v1063_v17 }
 0x406   : > { %v1186_v18 = vpop.eup %1185 }
 0x407   : > { %v640_v19 = vmul.f32 %v1186_v18, %v1182_v3 }
 0x409   : > { %1035 = vmatprep.mubr.msk.f32.mxu0 %vm619_vm6, %v640_v19 }
 0x40a   : > { %1036 = vmatmul.mubr.msk.f32.vlgmr.msra.gmra.mrb[2].mxu0 %vm619_vm6, %v641_v20 }
 0x4dd   : > { %v1037_v21 = vpop.f32.mrb[2].mxu0 }
 0x4de   : > { %v720_v22 = vpop.f32.mrb[3].mxu0 }
 0x4df   : > { %1046 = vmatprep.mubr.msk.f32.mxu1 %vm1881_vm1, %v720_v22 }
 0x4e0   : > { %1047 = vmatmul.mubr.msk.f32.vlgmr.msra.gmra.mrb[2].mxu1 %vm1882_vm10, %v1037_v21 }
 0x5b3   : > { %v1048_v24 = vpop.f32.mrb[2].mxu1 }
 0x5b4   : > { %v818_v25 = vadd.f32 %v1048_v24, %v983_v23  ;;  %v812_v26 = vpop.f32.mrb[3].mxu1 }
 0x5b5   : > { %v813_v27 = vadd.f32 %v983_v23, %v812_v26 }
 0x5b6   : > { %822 = vst.msk [vmem:[%s350_s16 + $0x8] sm:$0xff] %vm1883_vm3, %v818_v25 }
 0x5b7   : > { %821 = vst.msk [vmem:[%s350_s16] sm:$0xff] %vm1884_vm4, %v813_v27 }
 0x5b8   : > { %1314 = shalt.err (!%p1311_p5)
}
 0x5b9   : > { %s1315_s30 = scalar_lea.hbm %s1785_s19, 256  ;;  %s1319_s18 = scalar_lea.hbm %s1838_s7, 512 }
 0x5ba   : > { %p1316_p1 = scmp.ne.s32.totalorder %s1785_s19, %s1315_s30  ;;  %p1320_p11 = scmp.lt.u32.totalorder %s1785_s19, %s1838_s7 }
 0x5bb   : > { %p1321_p8 = scmp.lt.u32.totalorder %s1319_s18, %s1315_s30  ;;  %p1323_p12 = scmp.lt.u32.totalorder %s1315_s30, %s1785_s19 }
 0x5bc   : > { %p1317_p2 = pnand %p1316_p1, %p1576_p6 }
 0x5bd   : > { %p1322_p10 = por %p1321_p8, %p1320_p11 }
 0x5be   : > { %p1318_p4 = pneg %p1317_p2 }
 0x5bf   : > { %p1324_p3 = por %p1323_p12, %p1322_p10 }
 0x5c1   : > { %p1325_p7 = pnand %p1324_p3, %p1318_p4 }
 0x5c3   : > { %1328 = shalt.err (!%p1325_p7)
}
 0x5c4   : > { %s1392_s22 = smov 128   ;;  %s1393_s23 = smov 8  }
 0x5c5   : > { %1093 = dma.vmem_to_hbm [thread:$0]  (%p1576_p6), %s1780_s12, 256, %s1785_s19, %s824_s9, %s1392_s22, %s1392_s22, %s1393_s23  }
 0x5c6 PF: > { %s852_s28 = sand.u32 1, %s1367_s24   ;;  %p1885_p9 = scmp.ne.s32.totalorder %s1847_s8, 0 }
 0x5c7   : > { %p1886_p13 = scmp.ge.s32.totalorder %s1379_s27, 2  ;;  %s853_s11 = scalar_lea.sflag [#allocation4], %s852_s28 }
 0x5c9   : > { %p1113_p0 = pnand %p1886_p13, %p1885_p9 }
 0x5cb   : > { %1362 = dma.done.wait (!%p1113_p0), %s853_s11, 256  }
 0x5cc   : > { %1364 = vsyncadd (!%p1113_p0), %s853_s11, 4294967040  ;;  %p23_p5 = scmp.ge.s32.totalorder %s1566_s21, 4   ;;  %s1887_s24 = smov %s1371_s25 }
 0x5cd   : > { %s1888_s25 = smov %s1375_s26  ;;  %s1889_s26 = smov %s1582_s20 }
 0x5ce   : > { %s1890_s27 = smov %s1566_s21  ;;  %25 = sbr.rel (!%p23_p5) target bundleno = 10 (0xa), region = 111 }
 0x5d5   :  { %858 = vsyncpa [#allocation3], 1 }
 0x5d6   :  { %860 = vsyncpa [#allocation3 + $0x1], 1 }
 0x5d7   :  { %861 = vsyncpa [#allocation10], 1 }
 0x5d8   :  { %862 = vsyncpa [#allocation4], 1 }
 0x5d9   :  { %864 = vsyncpa [#allocation4 + $0x1], 1 }
 0x5da   :  { %865 = vsyncpa [#allocation5], 1 }
 0x5db   :  { %867 = vsyncpa [#allocation5 + $0x1], 1 }
 0x5dc   :  { %868 = vsyncpa [#allocation6], 1 }
 0x5dd   :  { %870 = vsyncpa [#allocation6 + $0x1], 1 }

</bundles_post_ra>
